<compile_context>
chip_gen: v6e
topology: v6e:2x2x1
jax: 0.10.0
libtpu: 0.0.40
codegen_flags: <defaults>
</compile_context>

<pallas_src>
import functools

import jax
import jax.numpy as jnp
import numpy as np
from jax.experimental import pallas as pl
from jax.experimental.pallas import tpu as pltpu


def _round_up(n, m):
    return -(-n // m) * m


def _mga_kernel(x_ref, w_ref, b_ref, oh_ref, mask_ref,
                out_ref, m_ref, s_ref, g_ref,
                segmax, segsum, *, gate_col):
    t = pl.program_id(0)

    @pl.when(t == 0)
    def _init():
        segmax[...] = jnp.full(segmax.shape, -1e30, jnp.float32)
        segsum[...] = jnp.zeros(segsum.shape, jnp.float32)
        out_ref[...] = jnp.zeros(out_ref.shape, out_ref.dtype)

    # Fused lane-dense MXU matmul (bf16 in, f32 accumulate):
    #   columns [0, C) -> h = nn(x), column C -> raw gate = gate_nn(x).
    hg = jnp.dot(x_ref[...], w_ref[...],
                 preferred_element_type=jnp.float32) + b_ref[...]     # (T, CP)
    g = hg[:, gate_col:gate_col + 1]                                  # (T, 1)
    ohf = oh_ref[...].astype(jnp.float32)                             # (T, BP)

    # Online (flash-style) per-graph running max / sum-of-exp.
    masked_g = jnp.where(ohf > 0.5, g, -1e30)                         # (T, BP)
    m_old = segmax[...]                                               # (1, BP)
    m_new = jnp.maximum(m_old, jnp.max(masked_g, axis=0, keepdims=True))
    alpha = jnp.exp(m_old - m_new)                                    # (1, BP)
    # Per-node running max gathered through the tiny one-hot (no infs: padded
    # rows get node_m = 0 and are zeroed by ohf below).
    node_m = jnp.sum(ohf * m_new, axis=1, keepdims=True)              # (T, 1)
    e = jnp.exp(g - node_m) * ohf                                     # (T, BP)
    segsum[...] = segsum[...] * alpha + jnp.sum(e, axis=0, keepdims=True)
    segmax[...] = m_new

    # alpha as a (BP, 1) column (diag-select + lane reduce; avoids a transpose).
    bp = out_ref.shape[0]
    rows = jax.lax.broadcasted_iota(jnp.int32, (bp, bp), 0)
    cols = jax.lax.broadcasted_iota(jnp.int32, (bp, bp), 1)
    alpha_col = jnp.sum(jnp.where(rows == cols, alpha, 0.0),
                        axis=1, keepdims=True)                        # (BP, 1)

    # out[b, :] = alpha[b] * out[b, :] + sum_n e[n, b] * mask[n] * h[n, :]
    # (bf16 operands, f32 accumulate; e is the gated one-hot so no extra LHS.)
    hm = (mask_ref[...] * hg).astype(jnp.bfloat16)                    # (T, CP)
    contrib = jax.lax.dot_general(
        e.astype(jnp.bfloat16), hm,
        dimension_numbers=(((0,), (0,)), ((), ())),
        preferred_element_type=jnp.float32)                           # (BP, CP)
    out_ref[...] = out_ref[...] * alpha_col + contrib

    # Raw (unnormalized) gate scores; exact softmax finalize happens on host.
    g_ref[...] = g

    @pl.when(t == pl.num_programs(0) - 1)
    def _finalize():
        m_ref[...] = segmax[...]
        s_ref[...] = segsum[...]


def my_global_attention(x, batch, set_zeros_ids, wg, bg, wn, bn, num_graphs,
                        *, tile_n=512):
    """Pallas forward of MyGlobalAttention with gate_nn=Linear(F,1), nn=Linear(F,C).

    x: (N, F) f32, batch: (N,) int32 sorted graph ids, set_zeros_ids: (N,) f32.
    Returns (out (num_graphs, C), gate (N, 1)).
    """
    N, F = x.shape
    C = wn.shape[1]
    B = int(num_graphs)

    tile_n = max(8, (int(tile_n) // 8) * 8)
    n_tiles = _round_up(N, tile_n) // tile_n
    n_pad = n_tiles * tile_n
    b_pad = _round_up(max(B, 1), 8)          # sublane-aligned number of graphs
    c_pad = _round_up(C + 1, 128)            # lane-dense fused [h | gate] width

    # ---- host-side layout prep (cheap XLA ops) ----
    x_p = jnp.zeros((n_pad, F), jnp.float32).at[:N].set(x).astype(jnp.bfloat16)
    w_fused = (jnp.zeros((F, c_pad), jnp.float32)
               .at[:, :C].set(wn)
               .at[:, C].set(wg[:, 0])).astype(jnp.bfloat16)
    b_fused = (jnp.zeros((1, c_pad), jnp.float32)
               .at[0, :C].set(bn)
               .at[0, C].set(bg[0]))
    onehot = (batch[:, None] == jnp.arange(b_pad, dtype=batch.dtype)[None, :])
    onehot = (jnp.zeros((n_pad, b_pad), jnp.float32)
              .at[:N].set(onehot.astype(jnp.float32))).astype(jnp.bfloat16)
    mask_col = jnp.zeros((n_pad, 1), jnp.float32).at[:N, 0].set(
        set_zeros_ids.astype(jnp.float32))

    # ---- VMEM budget: real (vreg-padded) per-step footprint, 2x headroom ----
    def _buf_bytes(rows, cols, itemsize):
        sub = 16 if itemsize == 2 else 8
        return _round_up(rows, sub) * _round_up(cols, 128) * itemsize
    per_block = (_buf_bytes(tile_n, F, 2)          # x tile (bf16)
                 + _buf_bytes(tile_n, b_pad, 2)    # one-hot tile (bf16)
                 + _buf_bytes(tile_n, 1, 4)        # set_zeros column
                 + _buf_bytes(tile_n, 1, 4)        # raw-gate output tile
                 + _buf_bytes(F, c_pad, 2)         # fused weights (resident)
                 + _buf_bytes(1, c_pad, 4)         # fused bias
                 + _buf_bytes(b_pad, c_pad, 4)     # pooled accumulator
                 + 2 * _buf_bytes(1, b_pad, 4))    # final m / s outputs
    scratch_bytes = 2 * _buf_bytes(1, b_pad, 4)
    vmem_limit = int(min(64 * 1024 * 1024,
                         max(4 * 1024 * 1024, 2 * (2 * per_block + scratch_bytes))))

    kernel = functools.partial(_mga_kernel, gate_col=C)

    out_acc, m_out, s_out, g_out = pl.pallas_call(
        kernel,
        out_shape=(jax.ShapeDtypeStruct((b_pad, c_pad), jnp.float32),
                   jax.ShapeDtypeStruct((1, b_pad), jnp.float32),
                   jax.ShapeDtypeStruct((1, b_pad), jnp.float32),
                   jax.ShapeDtypeStruct((n_pad, 1), jnp.float32)),
        grid_spec=pltpu.PrefetchScalarGridSpec(
            num_scalar_prefetch=0,
            grid=(n_tiles,),
            in_specs=[
                pl.BlockSpec((tile_n, F), lambda t: (t, 0)),      # x tile
                pl.BlockSpec((F, c_pad), lambda t: (0, 0)),       # fused W
                pl.BlockSpec((1, c_pad), lambda t: (0, 0)),       # fused bias
                pl.BlockSpec((tile_n, b_pad), lambda t: (t, 0)),  # one-hot tile
                pl.BlockSpec((tile_n, 1), lambda t: (t, 0)),      # set_zeros col
            ],
            out_specs=(
                pl.BlockSpec((b_pad, c_pad), lambda t: (0, 0)),   # pooled acc
                pl.BlockSpec((1, b_pad), lambda t: (0, 0)),       # final seg max
                pl.BlockSpec((1, b_pad), lambda t: (0, 0)),       # final seg sum
                pl.BlockSpec((tile_n, 1), lambda t: (t, 0)),      # raw gate scores
            ),
            scratch_shapes=[
                pltpu.VMEM((1, b_pad), jnp.float32),   # running segment max
                pltpu.VMEM((1, b_pad), jnp.float32),   # running segment sum-exp
            ]),
        compiler_params=pltpu.CompilerParams(
            # Single axis carries running stats + the resident accumulator.
            dimension_semantics=("arbitrary",),
            vmem_limit_bytes=vmem_limit),
    )(x_p, w_fused, b_fused, onehot, mask_col)

    # ---- tiny exact-f32 epilogue (softmax finalize + accumulator scaling) ----
    m_final = m_out[0, :B]
    s_final = s_out[0, :B]
    denom = s_final + 1e-16
    out = out_acc[:B, :C] / denom[:, None]
    gate = jnp.exp(g_out[:N, 0] - m_final[batch]) / denom[batch]
    return out, gate[:, None]


def reference_forward(x, batch, set_zeros_ids, wg, bg, wn, bn, num_graphs):
    """Pure-JAX reference reproducing the torch module semantics."""
    gate = x @ wg + bg.reshape(1, 1)                  # (N, 1)
    h = x @ wn + bn.reshape(1, -1)                    # (N, C)
    g = gate[:, 0]
    seg_max = jax.ops.segment_max(g, batch, num_segments=num_graphs)
    num = jnp.exp(g - seg_max[batch])
    seg_sum = jax.ops.segment_sum(num, batch, num_segments=num_graphs)
    gate_sm = num / (seg_sum[batch] + 1e-16)
    weighted = gate_sm[:, None] * h * set_zeros_ids[:, None]
    out = jax.ops.segment_sum(weighted, batch, num_segments=num_graphs)
    return out, gate_sm[:, None]


if __name__ == "__main__":
    N, F, C, B = 250, 32, 8, 3          # nodes, in_channels, out_channels, graphs

    key = jax.random.PRNGKey(0)
    kx, kwg, kbg, kwn, kbn = jax.random.split(key, 5)

    x = jax.random.normal(kx, (N, F), dtype=jnp.float32)
    sizes = (90, 80, 80)                # sorted graph assignment
    batch = jnp.concatenate([jnp.full((s,), i, dtype=jnp.int32)
                             for i, s in enumerate(sizes)])
    set_zeros_ids = (jnp.ones((N,), dtype=jnp.float32)
                     .at[3].set(0.0).at[100].set(0.0).at[200].set(0.0))

    wg = 0.1 * jax.random.normal(kwg, (F, 1), dtype=jnp.float32)
    bg = 0.1 * jax.random.normal(kbg, (1,), dtype=jnp.float32)
    wn = 0.1 * jax.random.normal(kwn, (F, C), dtype=jnp.float32)
    bn = 0.1 * jax.random.normal(kbn, (C,), dtype=jnp.float32)

    # Reference on the same bf16-rounded matmul inputs (kernel uses bf16 MXU).
    xr = x.astype(jnp.bfloat16).astype(jnp.float32)
    wgr = wg.astype(jnp.bfloat16).astype(jnp.float32)
    wnr = wn.astype(jnp.bfloat16).astype(jnp.float32)
    out_want, gate_want = reference_forward(xr, batch, set_zeros_ids,
                                            wgr, bg, wnr, bn, B)

    # tile_n=128 exercises the multi-tile online-softmax path (2 tiles);
    # tile_n=512 is the raised performance default (single tile at this N).
    for tile in (128, 512):
        out, gate = my_global_attention(x, batch, set_zeros_ids,
                                        wg, bg, wn, bn, B, tile_n=tile)
        jax.block_until_ready((out, gate))
        # Tolerance covers bf16 rounding of the pooled-matmul operands.
        np.testing.assert_allclose(np.asarray(out), np.asarray(out_want),
                                   rtol=2e-2, atol=1e-3)
        np.testing.assert_allclose(np.asarray(gate), np.asarray(gate_want),
                                   rtol=2e-2, atol=1e-4)

    print("KERNEL_OK")
</pallas_src>

<mosaic_0001>
module attributes {stable_mosaic.version = 11 : i64} {
  func.func @_mga_kernel(%arg0: i32, %arg1: memref<128x32xbf16, #tpu.memory_space<vmem>>, %arg2: memref<32x128xbf16, #tpu.memory_space<vmem>>, %arg3: memref<1x128xf32, #tpu.memory_space<vmem>>, %arg4: memref<128x8xbf16, #tpu.memory_space<vmem>>, %arg5: memref<128x1xf32, #tpu.memory_space<vmem>>, %arg6: memref<8x128xf32, #tpu.memory_space<vmem>>, %arg7: memref<1x8xf32, #tpu.memory_space<vmem>>, %arg8: memref<1x8xf32, #tpu.memory_space<vmem>>, %arg9: memref<128x1xf32, #tpu.memory_space<vmem>>, %arg10: memref<1x8xf32, #tpu.memory_space<vmem>>, %arg11: memref<1x8xf32, #tpu.memory_space<vmem>>) attributes {dimension_semantics = [#tpu.dimension_semantics<arbitrary>], iteration_bounds = array<i64: 2>, scalar_prefetch = 0 : i64, scratch_operands = 2 : i64, tpu.core_type = #tpu.core_type<tc>, window_params = [{transform_indices = @transform_0, window_bounds = array<i64: 128, 32>}, {pipeline_mode = #tpu.pipeline_mode<synchronous>, transform_indices = @transform_1, window_bounds = array<i64: 32, 128>}, {pipeline_mode = #tpu.pipeline_mode<synchronous>, transform_indices = @transform_2, window_bounds = array<i64: 1, 128>}, {transform_indices = @transform_3, window_bounds = array<i64: 128, 8>}, {transform_indices = @transform_4, window_bounds = array<i64: 128, 1>}, {pipeline_mode = #tpu.pipeline_mode<synchronous>, transform_indices = @transform_5, window_bounds = array<i64: 8, 128>}, {pipeline_mode = #tpu.pipeline_mode<synchronous>, transform_indices = @transform_6, window_bounds = array<i64: 1, 8>}, {pipeline_mode = #tpu.pipeline_mode<synchronous>, transform_indices = @transform_7, window_bounds = array<i64: 1, 8>}, {transform_indices = @transform_8, window_bounds = array<i64: 128, 1>}]} {
    %c0_i32 = arith.constant 0 : i32
    %0 = arith.cmpi eq, %arg0, %c0_i32 : i32
    %1 = arith.extui %0 : i1 to i32
    %c0_i32_0 = arith.constant 0 : i32
    %2 = arith.cmpi ne, %1, %c0_i32_0 : i32
    scf.if %2 {
      %cst_33 = arith.constant -1.000000e+30 : f32
      %63 = vector.broadcast %cst_33 : f32 to vector<1x8xf32>
      %c0_34 = arith.constant 0 : index
      %c0_35 = arith.constant 0 : index
      %64 = vector.load %arg10[%c0_34, %c0_35] : memref<1x8xf32, #tpu.memory_space<vmem>>, vector<1x8xf32>
      tpu.vector_store %arg10[%c0_34, %c0_35], %63 {strides = array<i32>} : memref<1x8xf32, #tpu.memory_space<vmem>>, vector<1x8xf32>,
      %cst_36 = arith.constant 0.000000e+00 : f32
      %65 = vector.broadcast %cst_36 : f32 to vector<1x8xf32>
      %c0_37 = arith.constant 0 : index
      %c0_38 = arith.constant 0 : index
      %66 = vector.load %arg11[%c0_37, %c0_38] : memref<1x8xf32, #tpu.memory_space<vmem>>, vector<1x8xf32>
      tpu.vector_store %arg11[%c0_37, %c0_38], %65 {strides = array<i32>} : memref<1x8xf32, #tpu.memory_space<vmem>>, vector<1x8xf32>,
      %cst_39 = arith.constant 0.000000e+00 : f32
      %67 = vector.broadcast %cst_39 : f32 to vector<8x128xf32>
      %c0_40 = arith.constant 0 : index
      %c0_41 = arith.constant 0 : index
      %68 = vector.load %arg6[%c0_40, %c0_41] : memref<8x128xf32, #tpu.memory_space<vmem>>, vector<8x128xf32>
      tpu.vector_store %arg6[%c0_40, %c0_41], %67 {strides = array<i32>} : memref<8x128xf32, #tpu.memory_space<vmem>>, vector<8x128xf32>,
    } else {
    }
    %c0 = arith.constant 0 : index
    %c0_1 = arith.constant 0 : index
    %3 = vector.load %arg1[%c0, %c0_1] : memref<128x32xbf16, #tpu.memory_space<vmem>>, vector<128x32xbf16>
    %c0_2 = arith.constant 0 : index
    %c0_3 = arith.constant 0 : index
    %4 = vector.load %arg2[%c0_2, %c0_3] : memref<32x128xbf16, #tpu.memory_space<vmem>>, vector<32x128xbf16>
    %cst = arith.constant dense<0.000000e+00> : vector<128x128xf32>
    %5 = tpu.matmul %3, %4, %cst {dimension_numbers = #tpu.dot_dimension_numbers<[1], [0], [0], [1], [0, 0, 1, 1], [], []>} : vector<128x32xbf16>, vector<32x128xbf16>, vector<128x128xf32> -> vector<128x128xf32>
    %c0_4 = arith.constant 0 : index
    %c0_5 = arith.constant 0 : index
    %6 = vector.load %arg3[%c0_4, %c0_5] : memref<1x128xf32, #tpu.memory_space<vmem>>, vector<1x128xf32>
    %7 = vector.broadcast %6 : vector<1x128xf32> to vector<128x128xf32>
    %8 = arith.addf %5, %7 : vector<128x128xf32>
    %9 = vector.extract_strided_slice %8 {offsets = [0, 8], sizes = [128, 1], strides = [1, 1]} : vector<128x128xf32> to vector<128x1xf32>
    %c0_6 = arith.constant 0 : index
    %c0_7 = arith.constant 0 : index
    %10 = vector.load %arg4[%c0_6, %c0_7] : memref<128x8xbf16, #tpu.memory_space<vmem>>, vector<128x8xbf16>
    %11 = arith.extf %10 : vector<128x8xbf16> to vector<128x8xf32>
    %cst_8 = arith.constant 5.000000e-01 : f32
    %12 = vector.broadcast %cst_8 : f32 to vector<128x8xf32>
    %13 = arith.cmpf ogt, %11, %12 : vector<128x8xf32>
    %cst_9 = arith.constant -1.000000e+30 : f32
    %14 = vector.shape_cast %9 : vector<128x1xf32> to vector<128x1xf32>
    %15 = vector.broadcast %14 : vector<128x1xf32> to vector<128x8xf32>
    %16 = vector.broadcast %cst_9 : f32 to vector<128x8xf32>
    %17 = arith.select %13, %15, %16 : vector<128x8xi1>, vector<128x8xf32>
    %c0_10 = arith.constant 0 : index
    %c0_11 = arith.constant 0 : index
    %18 = vector.load %arg10[%c0_10, %c0_11] : memref<1x8xf32, #tpu.memory_space<vmem>>, vector<1x8xf32>
    %cst_12 = arith.constant dense<0xFF800000> : vector<8xf32>
    %19 = vector.multi_reduction <maximumf>, %17, %cst_12 [0] : vector<128x8xf32> to vector<8xf32>
    %20 = vector.shape_cast %19 : vector<8xf32> to vector<1x8xf32>
    %21 = arith.maximumf %18, %20 : vector<1x8xf32>
    %22 = arith.subf %18, %21 : vector<1x8xf32>
    %23 = math.exp %22 : vector<1x8xf32>
    %24 = vector.broadcast %21 : vector<1x8xf32> to vector<128x8xf32>
    %25 = arith.mulf %11, %24 : vector<128x8xf32>
    %cst_13 = arith.constant dense<0.000000e+00> : vector<128xf32>
    %26 = vector.multi_reduction <add>, %25, %cst_13 [1] : vector<128x8xf32> to vector<128xf32>
    %27 = vector.shape_cast %26 : vector<128xf32> to vector<128x1xf32>
    %28 = arith.subf %9, %27 : vector<128x1xf32>
    %29 = math.exp %28 : vector<128x1xf32>
    %30 = vector.broadcast %29 : vector<128x1xf32> to vector<128x8xf32>
    %31 = arith.mulf %30, %11 : vector<128x8xf32>
    %c0_14 = arith.constant 0 : index
    %c0_15 = arith.constant 0 : index
    %32 = vector.load %arg11[%c0_14, %c0_15] : memref<1x8xf32, #tpu.memory_space<vmem>>, vector<1x8xf32>
    %33 = arith.mulf %32, %23 : vector<1x8xf32>
    %cst_16 = arith.constant dense<0.000000e+00> : vector<8xf32>
    %34 = vector.multi_reduction <add>, %31, %cst_16 [0] : vector<128x8xf32> to vector<8xf32>
    %35 = vector.shape_cast %34 : vector<8xf32> to vector<1x8xf32>
    %36 = arith.addf %33, %35 : vector<1x8xf32>
    %c0_17 = arith.constant 0 : index
    %c0_18 = arith.constant 0 : index
    %37 = vector.load %arg11[%c0_17, %c0_18] : memref<1x8xf32, #tpu.memory_space<vmem>>, vector<1x8xf32>
    tpu.vector_store %arg11[%c0_17, %c0_18], %36 {strides = array<i32>} : memref<1x8xf32, #tpu.memory_space<vmem>>, vector<1x8xf32>,
    %c0_19 = arith.constant 0 : index
    %c0_20 = arith.constant 0 : index
    %38 = vector.load %arg10[%c0_19, %c0_20] : memref<1x8xf32, #tpu.memory_space<vmem>>, vector<1x8xf32>
    tpu.vector_store %arg10[%c0_19, %c0_20], %21 {strides = array<i32>} : memref<1x8xf32, #tpu.memory_space<vmem>>, vector<1x8xf32>,
    %39 = tpu.iota {dimensions = array<i32: 0>} : vector<8x8xi32>
    %40 = tpu.iota {dimensions = array<i32: 1>} : vector<8x8xi32>
    %41 = arith.cmpi eq, %39, %40 : vector<8x8xi32>
    %cst_21 = arith.constant 0.000000e+00 : f32
    %42 = vector.shape_cast %23 : vector<1x8xf32> to vector<1x8xf32>
    %43 = vector.broadcast %42 : vector<1x8xf32> to vector<8x8xf32>
    %44 = vector.broadcast %cst_21 : f32 to vector<8x8xf32>
    %45 = arith.select %41, %43, %44 : vector<8x8xi1>, vector<8x8xf32>
    %cst_22 = arith.constant dense<0.000000e+00> : vector<8xf32>
    %46 = vector.multi_reduction <add>, %45, %cst_22 [1] : vector<8x8xf32> to vector<8xf32>
    %47 = vector.shape_cast %46 : vector<8xf32> to vector<8x1xf32>
    %c0_23 = arith.constant 0 : index
    %c0_24 = arith.constant 0 : index
    %48 = vector.load %arg5[%c0_23, %c0_24] : memref<128x1xf32, #tpu.memory_space<vmem>>, vector<128x1xf32>
    %49 = vector.broadcast %48 : vector<128x1xf32> to vector<128x128xf32>
    %50 = arith.mulf %49, %8 : vector<128x128xf32>
    %51 = arith.truncf %50 : vector<128x128xf32> to vector<128x128xbf16>
    %52 = arith.truncf %31 : vector<128x8xf32> to vector<128x8xbf16>
    %cst_25 = arith.constant dense<0.000000e+00> : vector<8x128xf32>
    %53 = tpu.matmul %52, %51, %cst_25 {dimension_numbers = #tpu.dot_dimension_numbers<[0], [0], [1], [1], [0, 1, 1, 1], [], []>} : vector<128x8xbf16>, vector<128x128xbf16>, vector<8x128xf32> -> vector<8x128xf32>
    %c0_26 = arith.constant 0 : index
    %c0_27 = arith.constant 0 : index
    %54 = vector.load %arg6[%c0_26, %c0_27] : memref<8x128xf32, #tpu.memory_space<vmem>>, vector<8x128xf32>
    %55 = vector.broadcast %47 : vector<8x1xf32> to vector<8x128xf32>
    %56 = arith.mulf %54, %55 : vector<8x128xf32>
    %57 = arith.addf %56, %53 : vector<8x128xf32>
    %c0_28 = arith.constant 0 : index
    %c0_29 = arith.constant 0 : index
    %58 = vector.load %arg6[%c0_28, %c0_29] : memref<8x128xf32, #tpu.memory_space<vmem>>, vector<8x128xf32>
    tpu.vector_store %arg6[%c0_28, %c0_29], %57 {strides = array<i32>} : memref<8x128xf32, #tpu.memory_space<vmem>>, vector<8x128xf32>,
    %c0_30 = arith.constant 0 : index
    %c0_31 = arith.constant 0 : index
    %59 = vector.load %arg9[%c0_30, %c0_31] : memref<128x1xf32, #tpu.memory_space<vmem>>, vector<128x1xf32>
    tpu.vector_store %arg9[%c0_30, %c0_31], %9 {strides = array<i32>} : memref<128x1xf32, #tpu.memory_space<vmem>>, vector<128x1xf32>,
    %c1_i32 = arith.constant 1 : i32
    %60 = arith.cmpi eq, %arg0, %c1_i32 : i32
    %61 = arith.extui %60 : i1 to i32
    %c0_i32_32 = arith.constant 0 : i32
    %62 = arith.cmpi ne, %61, %c0_i32_32 : i32
    scf.if %62 {
      %c0_33 = arith.constant 0 : index
      %c0_34 = arith.constant 0 : index
      %63 = vector.load %arg10[%c0_33, %c0_34] : memref<1x8xf32, #tpu.memory_space<vmem>>, vector<1x8xf32>
      %c0_35 = arith.constant 0 : index
      %c0_36 = arith.constant 0 : index
      %64 = vector.load %arg7[%c0_35, %c0_36] : memref<1x8xf32, #tpu.memory_space<vmem>>, vector<1x8xf32>
      tpu.vector_store %arg7[%c0_35, %c0_36], %63 {strides = array<i32>} : memref<1x8xf32, #tpu.memory_space<vmem>>, vector<1x8xf32>,
      %c0_37 = arith.constant 0 : index
      %c0_38 = arith.constant 0 : index
      %65 = vector.load %arg11[%c0_37, %c0_38] : memref<1x8xf32, #tpu.memory_space<vmem>>, vector<1x8xf32>
      %c0_39 = arith.constant 0 : index
      %c0_40 = arith.constant 0 : index
      %66 = vector.load %arg8[%c0_39, %c0_40] : memref<1x8xf32, #tpu.memory_space<vmem>>, vector<1x8xf32>
      tpu.vector_store %arg8[%c0_39, %c0_40], %65 {strides = array<i32>} : memref<1x8xf32, #tpu.memory_space<vmem>>, vector<1x8xf32>,
    } else {
    }
    return
  }
  func.func @transform_0(%arg0: i32) -> (i32, i32) {
    %c0_i32 = arith.constant 0 : i32
    %c0_i32_0 = arith.constant 0 : i32
    return %arg0, %c0_i32 : i32, i32
  }
  func.func @transform_1(%arg0: i32) -> (i32, i32) {
    %c0_i32 = arith.constant 0 : i32
    %c0_i32_0 = arith.constant 0 : i32
    %c0_i32_1 = arith.constant 0 : i32
    return %c0_i32, %c0_i32_0 : i32, i32
  }
  func.func @transform_2(%arg0: i32) -> (i32, i32) {
    %c0_i32 = arith.constant 0 : i32
    %c0_i32_0 = arith.constant 0 : i32
    %c0_i32_1 = arith.constant 0 : i32
    return %c0_i32, %c0_i32_0 : i32, i32
  }
  func.func @transform_3(%arg0: i32) -> (i32, i32) {
    %c0_i32 = arith.constant 0 : i32
    %c0_i32_0 = arith.constant 0 : i32
    return %arg0, %c0_i32 : i32, i32
  }
  func.func @transform_4(%arg0: i32) -> (i32, i32) {
    %c0_i32 = arith.constant 0 : i32
    %c0_i32_0 = arith.constant 0 : i32
    return %arg0, %c0_i32 : i32, i32
  }
  func.func @transform_5(%arg0: i32) -> (i32, i32) {
    %c0_i32 = arith.constant 0 : i32
    %c0_i32_0 = arith.constant 0 : i32
    %c0_i32_1 = arith.constant 0 : i32
    return %c0_i32, %c0_i32_0 : i32, i32
  }
  func.func @transform_6(%arg0: i32) -> (i32, i32) {
    %c0_i32 = arith.constant 0 : i32
    %c0_i32_0 = arith.constant 0 : i32
    %c0_i32_1 = arith.constant 0 : i32
    return %c0_i32, %c0_i32_0 : i32, i32
  }
  func.func @transform_7(%arg0: i32) -> (i32, i32) {
    %c0_i32 = arith.constant 0 : i32
    %c0_i32_0 = arith.constant 0 : i32
    %c0_i32_1 = arith.constant 0 : i32
    return %c0_i32, %c0_i32_0 : i32, i32
  }
  func.func @transform_8(%arg0: i32) -> (i32, i32) {
    %c0_i32 = arith.constant 0 : i32
    %c0_i32_0 = arith.constant 0 : i32
    return %arg0, %c0_i32 : i32, i32
  }
}

</mosaic_0001>

<bundles_post_ra>
// kernel: tpu_custom_call.1
= control target key start
LH: loop header
LB: loop body
LE: loop exit
PB: predicated region body
PF: predicated region fallthrough
CT: control target
= control target key end

     0   :  { %14 = vsyncpa [#allocation5], 0  ;;  %s2247_s0 = inlined_call_operand.vmem [shape: bf16[256,32], index: 0, kind: input, shape index: {}]   ;;  %s2248_s1 = inlined_call_operand.vmem [shape: bf16[32,128], index: 1, kind: input, shape index: {}]   ;;  %s2249_s2 = inlined_call_operand.vmem [shape: f32[1,128], index: 2, kind: input, shape index: {}]   ;;  %s2250_s3 = inlined_call_operand.vmem [shape: bf16[256,8], index: 3, kind: input, shape index: {}]   ;;  %s2251_s4 = inlined_call_operand.vmem [shape: f32[256,1], index: 4, kind: input, shape index: {}]   ;;  %s2252_s5 = inlined_call_operand.hbm [shape: f32[8,128], index: 5, kind: output, shape index: {0}]   ;;  %s2253_s6 = inlined_call_operand.hbm [shape: f32[1,8], index: 6, kind: output, shape index: {1}]   ;;  %s2254_s7 = inlined_call_operand.hbm [shape: f32[1,8], index: 7, kind: output, shape index: {2}]   ;;  %s2255_s8 = inlined_call_operand.vmem [shape: f32[256,1], index: 8, kind: output, shape index: {3}]  }
   0x1   :  { %15 = vsyncpa [#allocation7], 0  ;;  %s1793_s27 = smov 0  }
   0x2 LB: > { %s1799_s28 = sadd.s32 4294967295, %s1736_s27   ;;  %p1428_p0 = scmp.ge.s32.totalorder %s1736_s27, 1  ;;  %s1736_s27 = sphi %s1793_s27, %s21_s27  }
   0x3   : > { %p279_p1 = scmp.lt.s32.totalorder %s1736_s27, 3 }
   0x5   : > { %p280_p2 = pnand %p1428_p0, %p279_p1 }
   0x6   : > { %s1429_s29 = sshll.u32 (!%p280_p2), %s1799_s28, 4  ;;  %p1437_p4 = scmp.ne.s32.totalorder (!%p280_p2), %s1799_s28, 0 }
   0x7   : > { %283 = sbr.rel (%p280_p2) target bundleno = 1069 (0x42d), region = 40  ;;  %p324_p3 = scmp.lt.s32.totalorder (!%p280_p2), %s1429_s29, 31 }
   0xc   : > { %s2304_s29 = smov (!%p324_p3, %s1429_s29), 31  ;;  %351 = sbr.rel (%p1437_p4) target bundleno = 20 (0x14), region = 44 }
   0xd   : > { %s1430_s30 = sshll.u32 %s2304_s29, 2  ;;  %s1434_s9 = sshll.u32 %s2304_s29, 3 }
   0xe   : > { %s1807_s12 = scalar_lea.vmem %s2247_s0, %s1430_s30  ;;  %s1812_s15 = scalar_lea.vmem %s2250_s3, %s1430_s30 }
   0xf   : > { %s1817_s18 = scalar_lea.vmem %s2251_s4, %s1434_s9  ;;  %s1822_s21 = scalar_lea.vmem %s2255_s8, %s1434_s9 }
  0x11   : > { %vm352_vm0 = vcmask 57344   ;;  %v1738_v0 = vmov -1e+30   ;;  %v1739_v1 = vmov 0.0  }
  0x12   : > { %353 = vst.msk [vmem:[#allocation2] sm:$0x1] %vm352_vm0, %v1738_v0  ;;  %354 = vst.msk [vmem:[#allocation3] sm:$0x1] %vm352_vm0, %v1739_v1 }
  0x13   : > { %355 = vst [vmem:[#allocation4] sm:$0xff] %v1739_v1 }
  0x14 PF: > { %v1606_v2 = vld [vmem:[%s2248_s1 + $0x8] sm:$0xff]   ;;  %v1607_v3 = vld [vmem:[%s2248_s1] sm:$0xff]   ;;  %vm435_vm1 = vcmask 261120   ;;  %v1610_v6 = vld [vmem:[%s1807_s12 + $0x10] sm:$0xff]   ;;  %v1740_v12 = vmov 8   ;;  %v745_v46 = vlaneseq  ;;  %s1743_s30 = smov 120  }
  0x15   : > { %1524 = vmatprep.subr.bf16.mxu0 %v1606_v2  ;;  %v1608_v4 = vld [vmem:[%s1807_s12] sm:$0xff]   ;;  %v1609_v5 = vld [vmem:[%s1807_s12 + $0x8] sm:$0xff]   ;;  %v1611_v7 = vld [vmem:[%s1807_s12 + $0x18] sm:$0xff]   ;;  %1600 = vset.pattern.permute.xlu1 %v1740_v12  ;;  %p1457_p5 = scmp.ne.s32.totalorder %s1799_s28, 1 }
  0x16   : > { %1525 = vmatpush3.bf16.msra.mxu0 %v1606_v2  ;;  %1528 = vmatprep.mubr.msk.bf16.mxu0 %vm435_vm1, %v1608_v4  ;;  %v1612_v8 = vld [vmem:[%s1807_s12 + $0x20] sm:$0xff]   ;;  %v1613_v9 = vld [vmem:[%s1807_s12 + $0x28] sm:$0xff]   ;;  %v1614_v10 = vld [vmem:[%s1807_s12 + $0x30] sm:$0xff]   ;;  %v1900_v47 = vshrl.u32 %v745_v46, 7  ;;  %v1902_v48 = vand.u32 127, %v745_v46 }
  0x17   : > { %1526 = vmatprep.subr.bf16.mxu0 %v1607_v3  ;;  %v1615_v11 = vld [vmem:[%s1807_s12 + $0x38] sm:$0xff]   ;;  %1601 = vset.pattern.permute.xlu0 %v1740_v12  ;;  %v1438_v13 = vld [vmem:[%s2249_s2] ss:$0 sm:$0xff]  ;;  %v1498_v55 = vld [vmem:[%s1812_s15 + $0x8] sm:$0xff]  }
  0x18   : > { %v1467_v56 = vld [vmem:[%s1812_s15] sm:$0xff]   ;;  %v1500_v57 = vld [vmem:[%s1812_s15 + $0x18] sm:$0xff]   ;;  %v1499_v59 = vld [vmem:[%s1812_s15 + $0x10] sm:$0xff]   ;;  %v1911_v61 = vunpack.c.l.bf16 %v1498_v55  ;;  %v1917_v2 = vunpack.c.h.bf16 %v1498_v55 }
  0x19   : > { %v1502_v60 = vld [vmem:[%s1812_s15 + $0x28] sm:$0xff]   ;;  %v1501_v63 = vld [vmem:[%s1812_s15 + $0x20] sm:$0xff]   ;;  %v1503_v0 = vld [vmem:[%s1812_s15 + $0x30] sm:$0xff]   ;;  %v1915_v1 = vunpack.c.l.bf16 %v1467_v56  ;;  %v1921_v4 = vunpack.c.l.bf16 %v1500_v57 }
  0x1a   : > { %1527 = vmatpush3.bf16.msra.mxu0 %v1607_v3  ;;  %v1919_v3 = vunpack.c.h.bf16 %v1467_v56  ;;  %vm591_vm4 = vcmp.gt.f32.partialorder %v1911_v61, 0.5  ;;  %vm592_vm6 = vcmp.gt.f32.partialorder %v1917_v2, 0.5 }
  0x1b   : > { %vm589_vm5 = vcmp.gt.f32.partialorder %v1915_v1, 0.5  ;;  %vm595_vm8 = vcmp.gt.f32.partialorder %v1921_v4, 0.5 }
  0x1c   : > { %vm590_vm7 = vcmp.gt.f32.partialorder %v1919_v3, 0.5 }
  0x1d   : > { %1529 = vmatmul.mubr.msk.bf16.vlgmr.msra.gmra.mxu0 %vm435_vm1, %v1609_v5  ;;  %v1504_v5 = vld [vmem:[%s1812_s15 + $0x38] sm:$0xff]  }
  0x1e   : > { %1532 = vmatprep.mubr.msk.bf16.mxu0 %vm435_vm1, %v1610_v6  ;;  %v1924_v6 = vunpack.c.h.bf16 %v1500_v57 }
  0x20   : > { %vm596_vm9 = vcmp.gt.f32.partialorder %v1924_v6, 0.5 }
  0x25   : > { %1533 = vmatmul.mubr.msk.bf16.gmra.mxu0 %vm435_vm1, %v1611_v7  ;;  %v1926_v7 = vunpack.c.l.bf16 %v1499_v59 }
  0x26   : > { %1536 = vmatprep.mubr.msk.bf16.mxu0 %vm435_vm1, %v1612_v8  ;;  %v1928_v8 = vunpack.c.h.bf16 %v1499_v59 }
  0x27   : > { %vm593_vm10 = vcmp.gt.f32.partialorder %v1926_v7, 0.5 }
  0x28   : > { %vm594_vm11 = vcmp.gt.f32.partialorder %v1928_v8, 0.5 }
  0x2d   : > { %1537 = vmatmul.mubr.msk.bf16.gmra.mxu0 %vm435_vm1, %v1613_v9  ;;  %v1930_v9 = vunpack.c.l.bf16 %v1502_v60 }
  0x2e   : > { %1540 = vmatprep.mubr.msk.bf16.mxu0 %vm435_vm1, %v1614_v10 }
  0x2f   : > { %vm599_vm12 = vcmp.gt.f32.partialorder %v1930_v9, 0.5 }
  0x35   : > { %1541 = vmatmul.mubr.msk.bf16.gmra.mxu0 %vm435_vm1, %v1615_v11  ;;  %v1932_v11 = vunpack.c.h.bf16 %v1502_v60 }
  0x37   : > { %vm600_vm13 = vcmp.gt.f32.partialorder %v1932_v11, 0.5 }
  0xdd   : > { %v1530_v14 = vpop.f32.mrf.mxu0 }
  0xde   : > { %v1852_v15 = vadd.f32 %v1530_v14, %v1438_v13  ;;  %v1936_v14 = vunpack.c.h.bf16 %v1501_v63 }
  0xdf   : > { %v494_v16 = vpop.f32.mrf.mxu0 }
  0xe0   : > { %v1854_v17 = vadd.f32 %v1438_v13, %v494_v16  ;;  %617 = vperm.xlu1 %1600, %v1852_v15   ;;  %v1938_v16 = vunpack.c.l.bf16 %v1503_v0  ;;  %vm598_vm15 = vcmp.gt.f32.partialorder %v1936_v14, 0.5 }
  0xe1   : > { %v1531_v18 = vpop.f32.mrf.mxu0 }
  0xe2   : > { %v1857_v19 = vadd.f32 %v1531_v18, %v1438_v13  ;;  %607 = vperm.xlu0 %1601, %v1854_v17   ;;  %vm601_vm0 = vcmp.gt.f32.partialorder %v1938_v16, 0.5 }
  0xe3   : > { %v497_v20 = vpop.f32.mrf.mxu0 }
  0xe4   : > { %v1860_v21 = vadd.f32 %v1438_v13, %v497_v20  ;;  %622 = vperm.xlu1 %1600, %v1857_v19   ;;  %v1941_v20 = vunpack.c.h.bf16 %v1503_v0 }
  0xe5   : > { %v1534_v22 = vpop.f32.mrf.mxu0 }
  0xe6   : > { %612 = vperm.xlu0 %1601, %v1860_v21   ;;  %v1864_v24 = vadd.f32 %v1534_v22, %v1438_v13  ;;  %v1943_v22 = vunpack.c.l.bf16 %v1504_v5  ;;  %vm602_vm1 = vcmp.gt.f32.partialorder %v1941_v20, 0.5 }
  0xe7   : > { %v510_v23 = vpop.f32.mrf.mxu0 }
  0xe8   : > { %v1869_v28 = vadd.f32 %v1438_v13, %v510_v23  ;;  %v1945_v23 = vunpack.c.h.bf16 %v1504_v5  ;;  %vm603_vm2 = vcmp.gt.f32.partialorder %v1943_v22, 0.5 }
  0xe9   : > { %v1535_v25 = vpop.f32.mrf.mxu0 }
  0xea   : > { %v1866_v26 = vadd.f32 %v1535_v25, %v1438_v13  ;;  %637 = vperm.xlu0 %1601, %v1864_v24   ;;  %vm604_vm3 = vcmp.gt.f32.partialorder %v1945_v23, 0.5 }
  0xeb   : > { %v513_v27 = vpop.f32.mrf.mxu0 }
  0xec   : > { %642 = vperm.xlu1 %1600, %v1866_v26   ;;  %v1872_v30 = vadd.f32 %v1438_v13, %v513_v27 }
  0xed   : > { %v1538_v29 = vpop.f32.mrf.mxu0 }
  0xee   : > { %627 = vperm.xlu0 %1601, %v1869_v28   ;;  %v1875_v32 = vadd.f32 %v1538_v29, %v1438_v13 }
  0xef   : > { %v526_v31 = vpop.f32.mrf.mxu0 }
  0xf0   : > { %632 = vperm.xlu1 %1600, %v1872_v30   ;;  %v1881_v36 = vadd.f32 %v1438_v13, %v526_v31 }
  0xf1   : > { %v1539_v33 = vpop.f32.mrf.mxu0 }
  0xf2   : > { %v1878_v34 = vadd.f32 %v1539_v33, %v1438_v13  ;;  %657 = vperm.xlu0 %1601, %v1875_v32  }
  0xf3   : > { %v529_v35 = vpop.f32.mrf.mxu0 }
  0xf4   : > { %662 = vperm.xlu1 %1600, %v1878_v34   ;;  %v1884_v38 = vadd.f32 %v1438_v13, %v529_v35 }
  0xf5   : > { %v1542_v37 = vpop.f32.mrf.mxu0 }
  0xf6   : > { %647 = vperm.xlu0 %1601, %v1881_v36   ;;  %v1891_v43 = vadd.f32 %v1542_v37, %v1438_v13 }
  0xf7   : > { %v542_v39 = vpop.f32.mrf.mxu0 }
  0xf8   : > { %v1887_v40 = vadd.f32 %v1438_v13, %v542_v39  ;;  %652 = vperm.xlu1 %1600, %v1884_v38  }
  0xf9   : > { %v1543_v41 = vpop.f32.mrf.mxu0 }
  0xfa   : > { %667 = vperm.xlu0 %1601, %v1887_v40   ;;  %v1897_v45 = vadd.f32 %v1543_v41, %v1438_v13 }
  0xfb   : > { %v545_v42 = vpop.f32.mrf.mxu0 }
  0xfc   : > { %v1893_v44 = vadd.f32 %v1438_v13, %v545_v42  ;;  %v1934_v13 = vunpack.c.l.bf16 %v1501_v63 }
  0xfe   : > { %672 = vperm.xlu1 %1600, %v1893_v44   ;;  %677 = vperm.xlu0 %1601, %v1891_v43   ;;  %vm597_vm14 = vcmp.gt.f32.partialorder %v1934_v13, 0.5 }
 0x102   : > { %682 = vperm.xlu1 %1600, %v1897_v45  }
 0x15b   : > { %v618_v49 = vpop.permute.xlu1 %617 }
 0x15c   : > { %v687_v27 = vsel %vm591_vm4, %v618_v49, -1e+30  ;;  %vm2256_vm4 = vcmask 64512  }
 0x15d   : > { %v608_v50 = vpop.permute.xlu0 %607 }
 0x15e   : > { %v685_v31 = vsel %vm589_vm5, %v608_v50, -1e+30  ;;  %vm2257_vm5 = vmmov %vm2256_vm4 }
 0x15f   : > { %v623_v52 = vpop.permute.xlu1 %622 }
 0x160   : > { %v688_v33 = vsel %vm592_vm6, %v623_v52, -1e+30  ;;  %v705_v52 = vsel %vm2256_vm4, %v687_v27, -inf  ;;  %vm2258_vm6 = vmmov %vm2256_vm4 }
 0x161   : > { %v613_v51 = vpop.permute.xlu0 %612  ;;  %v706_v55 = vsel %vm2258_vm6, %v688_v33, -inf }
 0x162   : > { %v686_v37 = vsel %vm590_vm7, %v613_v51, -1e+30  ;;  %v703_v51 = vsel %vm2257_vm5, %v685_v31, -inf  ;;  %vm2259_vm7 = vmmov %vm2256_vm4 }
 0x163   : > { %vm2268_vm5 = vmmov %vm2256_vm4 }
 0x165   : > { %v638_v53 = vpop.permute.xlu0 %637 }
 0x166   : > { %v691_v39 = vsel %vm595_vm8, %v638_v53, -1e+30  ;;  %vm2260_vm8 = vmmov %vm2256_vm4 }
 0x167   : > { %v643_v54 = vpop.permute.xlu1 %642 }
 0x168   : > { %v692_v41 = vsel %vm596_vm9, %v643_v54, -1e+30  ;;  %v704_v54 = vsel %vm2260_vm8, %v686_v37, -inf  ;;  %vm2261_vm9 = vmmov %vm2256_vm4 }
 0x169   : > { %v628_v58 = vpop.permute.xlu0 %627  ;;  %v711_v56 = vsel %vm2261_vm9, %v691_v39, -inf }
 0x16a   : > { %v689_v46 = vsel %vm593_vm10, %v628_v58, -1e+30  ;;  %vm2262_vm10 = vmmov %vm2256_vm4 }
 0x16b   : > { %v633_v62 = vpop.permute.xlu1 %632  ;;  %v713_v59 = vsel %vm2262_vm10, %v692_v41, -inf }
 0x16c   : > { %v690_v35 = vsel %vm594_vm11, %v633_v62, -1e+30  ;;  %vm2263_vm11 = vmmov %vm2256_vm4  ;;  %v714_v37 = vmax.f32 %v706_v55, %v713_v59 }
 0x16d   : > { %v658_v10 = vpop.permute.xlu0 %657  ;;  %v709_v53 = vsel %vm2259_vm7, %v690_v35, -inf  ;;  %v707_v60 = vsel %vm2263_vm11, %v689_v46, -inf }
 0x16e   : > { %v695_v49 = vsel %vm599_vm12, %v658_v10, -1e+30  ;;  %vm2264_vm12 = vmmov %vm2256_vm4  ;;  %v710_v10 = vmax.f32 %v704_v54, %v709_v53  ;;  %v708_v39 = vmax.f32 %v703_v51, %v707_v60 }
 0x16f   : > { %v663_v18 = vpop.permute.xlu1 %662  ;;  %v719_v62 = vsel %vm2264_vm12, %v695_v49, -inf }
 0x170   : > { %v696_v57 = vsel %vm600_vm13, %v663_v18, -1e+30  ;;  %vm2266_vm13 = vmmov %vm2256_vm4 }
 0x171   : > { %v648_v25 = vpop.permute.xlu0 %647  ;;  %v721_v31 = vsel %vm2266_vm13, %v696_v57, -inf }
 0x172   : > { %v693_v58 = vsel %vm597_vm14, %v648_v25, -1e+30  ;;  %vm2267_vm14 = vmmov %vm2256_vm4  ;;  %v722_v53 = vmax.f32 %v714_v37, %v721_v31 }
 0x173   : > { %v653_v29 = vpop.permute.xlu1 %652  ;;  %v715_v33 = vsel %vm2267_vm14, %v693_v58, -inf }
 0x174   : > { %v694_v50 = vsel %vm598_vm15, %v653_v29, -1e+30  ;;  %vm2265_vm15 = vmmov %vm2256_vm4  ;;  %v712_v29 = vmax.f32 %v705_v52, %v711_v56  ;;  %v716_v54 = vmax.f32 %v708_v39, %v715_v33 }
 0x175   : > { %v668_v42 = vpop.permute.xlu0 %667  ;;  %v717_v63 = vsel %vm2265_vm15, %v694_v50, -inf }
 0x176   : > { %v697_v27 = vsel %vm601_vm0, %v668_v42, -1e+30  ;;  %v718_v41 = vmax.f32 %v710_v10, %v717_v63  ;;  %v720_v46 = vmax.f32 %v712_v29, %v719_v62  ;;  %vm2269_vm0 = vmmov %vm2256_vm4 }
 0x177   : > { %v723_v49 = vsel %vm2268_vm5, %v697_v27, -inf  ;;  %vm2272_vm6 = vmmov %vm2269_vm0 }
 0x178   : > { %v724_v57 = vmax.f32 %v716_v54, %v723_v49  ;;  %vm2273_vm7 = vmmov %vm2269_vm0 }
 0x179   : > { %v673_v0 = vpop.permute.xlu1 %672  ;;  %v678_v5 = vpop.permute.xlu0 %677  ;;  %vm2274_vm8 = vmmov %vm2269_vm0 }
 0x17a   : > { %v698_v18 = vsel %vm602_vm1, %v673_v0, -1e+30  ;;  %v699_v25 = vsel %vm603_vm2, %v678_v5, -1e+30  ;;  %vm2270_vm2 = vmmov %vm2269_vm0  ;;  %vm998_vm1 = vcmask 57344  }
 0x17b   : > { %v725_v35 = vsel %vm2256_vm4, %v698_v18, -inf  ;;  %v727_v42 = vsel %vm2269_vm0, %v699_v25, -inf  ;;  %v701_v18 = vld [vmem:[#allocation2] sm:$0x1]  ;;  %v747_v25 = vsub.s32 0, %v1900_v47  ;;  %vm2275_vm9 = vmmov %vm2269_vm0 }
 0x17c   : > { %v726_v0 = vmax.f32 %v718_v41, %v725_v35  ;;  %v728_v58 = vmax.f32 %v720_v46, %v727_v42  ;;  %vm2276_vm10 = vmmov %vm2269_vm0 }
 0x17d   : > { %v683_v50 = vpop.permute.xlu1 %682  ;;  %vm2277_vm11 = vmmov %vm2269_vm0 }
 0x17e   : > { %v700_v52 = vsel %vm604_vm3, %v683_v50, -1e+30  ;;  %v731_v55 = vmax.f32 %v724_v57, %v726_v0  ;;  %vm2271_vm3 = vmmov %vm2269_vm0 }
 0x17f   : > { %v729_v56 = vsel %vm2270_vm2, %v700_v52, -inf  ;;  %vm2278_vm12 = vmmov %vm2269_vm0  ;;  %vm2284_vm2 = vcmp.eq.s32.totalorder %v1900_v47, %v1902_v48 }
 0x180   : > { %v730_v5 = vmax.f32 %v722_v53, %v729_v56  ;;  %vm2279_vm15 = vmmov %vm2269_vm0 }
 0x181   : > { %vm2280_vm13 = vmmov %vm2269_vm0 }
 0x182   : > { %v732_v51 = vmax.f32 %v728_v58, %v730_v5  ;;  %vm2281_vm14 = vmmov %vm2269_vm0 }
 0x183   : > { %vm2282_vm4 = vmmov %vm2269_vm0 }
 0x184   : > { %v733_v59 = vmax.f32 %v731_v55, %v732_v51  ;;  %vm2283_vm5 = vmmov %vm2269_vm0 }
 0x186   : > { %v734_v60 = vrot.slane %v733_v59, 4 }
 0x188   : > { %v735_v62 = vmax.f32 %v733_v59, %v734_v60 }
 0x18a   : > { %v736_v63 = vrot.slane %v735_v62, 2 }
 0x18c   : > { %v737_v10 = vmax.f32 %v735_v62, %v736_v63 }
 0x18e   : > { %v738_v27 = vrot.slane %v737_v10, 1 }
 0x190   : > { %v739_v29 = vmax.f32 %v737_v10, %v738_v27 }
 0x192   : > { %v740_v31 = vmax.f32 %v701_v18, %v739_v29 }
 0x194   : > { %v748_v33 = vrot.slane %v740_v31, %v747_v25  ;;  %v741_v35 = vsub.f32 %v701_v18, %v740_v31  ;;  %1000 = vst.msk [vmem:[#allocation2] sm:$0x1] %vm998_vm1, %v740_v31 }
 0x196   : > { %v751_v37 = vmul.f32 %v1919_v3, %v748_v33  ;;  %v750_v39 = vmul.f32 %v1915_v1, %v748_v33  ;;  %v754_v49 = vmul.f32 %v1926_v7, %v748_v33  ;;  %v752_v42 = vmul.f32 %v1911_v61, %v748_v33 }
 0x197   : > { %v756_v54 = vmul.f32 %v1921_v4, %v748_v33  ;;  %v753_v0 = vmul.f32 %v1917_v2, %v748_v33  ;;  %v742_v52 = vmul.f32 1.442695, %v741_v35  ;;  %v758_v56 = vmul.f32 %v1934_v13, %v748_v33 }
 0x198   : > { %v769_v41 = vsel %vm2271_vm3, %v751_v37, 0.0  ;;  %v766_v46 = vsel %vm2272_vm6, %v750_v39, 0.0  ;;  %v778_v50 = vsel %vm2273_vm7, %v754_v49, 0.0  ;;  %v772_v53 = vsel %vm2274_vm8, %v752_v42, 0.0  ;;  %vm2285_vm3 = vmmov %vm2269_vm0 }
 0x199   : > { %770 = vadd.xlane.f32.xlu1 %v769_v41  ;;  %767 = vadd.xlane.f32.xlu0 %v766_v46  ;;  %v784_v57 = vsel %vm2275_vm9, %v756_v54, 0.0  ;;  %v775_v58 = vsel %vm2276_vm10, %v753_v0, 0.0  ;;  %v755_v5 = vmul.f32 %v1928_v8, %v748_v33  ;;  %1616 = vpow2.f32 %v742_v52  ;;  %vm2286_vm6 = vmmov %vm2269_vm0 }
 0x19a   : > { %v790_v55 = vsel %vm2277_vm11, %v758_v56, 0.0  ;;  %v760_v59 = vmul.f32 %v1930_v9, %v748_v33  ;;  %v757_v60 = vmul.f32 %v1924_v6, %v748_v33  ;;  %v762_v10 = vmul.f32 %v1938_v16, %v748_v33  ;;  %vm2287_vm7 = vmmov %vm2269_vm0 }
 0x19b   : > { %v781_v51 = vsel %vm2278_vm12, %v755_v5, 0.0  ;;  %v759_v27 = vmul.f32 %v1936_v14, %v748_v33  ;;  %v764_v31 = vmul.f32 %v1943_v22, %v748_v33  ;;  %v761_v35 = vmul.f32 %v1932_v11, %v748_v33  ;;  %vm2288_vm9 = vmmov %vm2269_vm0 }
 0x19c   : > { %v796_v62 = vsel %vm2279_vm15, %v760_v59, 0.0  ;;  %v787_v63 = vsel %vm2280_vm13, %v757_v60, 0.0  ;;  %v802_v18 = vsel %vm2281_vm14, %v762_v10, 0.0  ;;  %v763_v49 = vmul.f32 %v1941_v20, %v748_v33  ;;  %vm2289_vm10 = vmmov %vm2269_vm0 }
 0x19d   : > { %779 = vadd.xlane.f32.xlu1 %v778_v50  ;;  %773 = vadd.xlane.f32.xlu0 %v772_v53  ;;  %v793_v29 = vsel %vm2282_vm4, %v759_v27, 0.0  ;;  %v808_v41 = vsel %vm2283_vm5, %v764_v31, 0.0  ;;  %v799_v46 = vsel %vm2269_vm0, %v761_v35, 0.0  ;;  %v765_v53 = vmul.f32 %v1945_v23, %v748_v33  ;;  %vm2290_vm11 = vmmov %vm2269_vm0 }
 0x19e   : > { %v805_v50 = vsel %vm2285_vm3, %v763_v49, 0.0  ;;  %vm1744_vm8 = vmmov 0   ;;  %vm2291_vm12 = vmmov %vm2269_vm0 }
 0x19f   : > { %vm2292_vm15 = vmmov %vm2269_vm0 }
 0x1a0   : > { %vm2293_vm13 = vmmov %vm2269_vm0 }
 0x1a1   : > { %785 = vadd.xlane.f32.xlu1 %v784_v57  ;;  %776 = vadd.xlane.f32.xlu0 %v775_v58  ;;  %vm2294_vm14 = vmmov %vm2269_vm0 }
 0x1a2   : > { %vm2295_vm4 = vmmov %vm2269_vm0 }
 0x1a3   : > { %vm2296_vm5 = vmmov %vm2269_vm0 }
 0x1a4   : > { %vm2298_vm3 = vmmov %vm2269_vm0 }
 0x1a5   : > { %791 = vadd.xlane.f32.xlu1 %v790_v55  ;;  %782 = vadd.xlane.f32.xlu0 %v781_v51 }
 0x1a6   : > { %v2036_v37 = vpop.eup %1616 }
 0x1a7   : > { %v1010_v39 = vrot.slane %v2036_v37, %v747_v25  ;;  %v811_v25 = vsel %vm2286_vm6, %v765_v53, 0.0  ;;  %vm2299_vm6 = vmmov %vm2269_vm0 }
 0x1a9   : > { %797 = vadd.xlane.f32.xlu1 %v796_v62  ;;  %788 = vadd.xlane.f32.xlu0 %v787_v63  ;;  %v2045_v42 = vsel %vm2284_vm2, %v1010_v39, 0.0  ;;  %vm2297_vm2 = vmmov %vm2269_vm0 }
 0x1ad   : > { %803 = vadd.xlane.f32.xlu1 %v802_v18  ;;  %794 = vadd.xlane.f32.xlu0 %v793_v29 }
 0x1b1   : > { %809 = vadd.xlane.f32.xlu1 %v808_v41  ;;  %800 = vadd.xlane.f32.xlu0 %v799_v46 }
 0x1b5   : > { %806 = vadd.xlane.f32.xlu0 %v805_v50 }
 0x1b9   : > { %812 = vadd.xlane.f32.xlu0 %v811_v25 }
 0x222   : > { %v771_v54 = vpop.xlane.xlu1 %770  ;;  %v768_v0 = vpop.xlane.xlu0 %767 }
 0x223   : > { %v815_v52 = vsub.f32 %v1860_v21, %v771_v54  ;;  %v814_v56 = vsub.f32 %v1854_v17, %v768_v0 }
 0x225   : > { %v832_v57 = vmul.f32 1.442695, %v815_v52  ;;  %v830_v47 = vmul.f32 1.442695, %v814_v56 }
 0x226   : > { %v780_v48 = vpop.xlane.xlu1 %779  ;;  %v774_v58 = vpop.xlane.xlu0 %773 }
 0x227   : > { %1618 = vpow2.f32 %v832_v57  ;;  %v818_v5 = vsub.f32 %v1869_v28, %v780_v48  ;;  %v816_v55 = vsub.f32 %v1852_v15, %v774_v58 }
 0x228   : > { %1620 = vpow2.f32 %v830_v47 }
 0x229   : > { %v838_v33 = vmul.f32 1.442695, %v818_v5  ;;  %v834_v51 = vmul.f32 1.442695, %v816_v55 }
 0x22a   : > { %v786_v59 = vpop.xlane.xlu1 %785  ;;  %v777_v60 = vpop.xlane.xlu0 %776 }
 0x22b   : > { %1622 = vpow2.f32 %v838_v33  ;;  %v820_v62 = vsub.f32 %v1864_v24, %v786_v59  ;;  %v817_v63 = vsub.f32 %v1857_v19, %v777_v60 }
 0x22c   : > { %1624 = vpow2.f32 %v834_v51 }
 0x22d   : > { %v842_v10 = vmul.f32 1.442695, %v820_v62  ;;  %v836_v27 = vmul.f32 1.442695, %v817_v63 }
 0x22e   : > { %v792_v18 = vpop.xlane.xlu1 %791  ;;  %v783_v29 = vpop.xlane.xlu0 %782 }
 0x22f   : > { %1626 = vpow2.f32 %v842_v10  ;;  %v822_v31 = vsub.f32 %v1881_v36, %v792_v18  ;;  %v819_v35 = vsub.f32 %v1872_v30, %v783_v29 }
 0x230   : > { %1628 = vpow2.f32 %v836_v27 }
 0x231   : > { %v846_v39 = vmul.f32 1.442695, %v822_v31  ;;  %v840_v41 = vmul.f32 1.442695, %v819_v35 }
 0x232   : > { %v798_v46 = vpop.xlane.xlu1 %797  ;;  %v789_v49 = vpop.xlane.xlu0 %788 }
 0x233   : > { %1630 = vpow2.f32 %v846_v39  ;;  %v824_v50 = vsub.f32 %v1875_v32, %v798_v46  ;;  %v821_v53 = vsub.f32 %v1866_v26, %v789_v49 }
 0x234   : > { %v1619_v25 = vpop.eup %1618  ;;  %1632 = vpow2.f32 %v840_v41 }
 0x235   : > { %v1621_v54 = vpop.eup %1620  ;;  %v850_v0 = vmul.f32 1.442695, %v824_v50  ;;  %v844_v52 = vmul.f32 1.442695, %v821_v53  ;;  %869 = vperm.xlu0 %1601, %v1619_v25  }
 0x236   : > { %864 = vperm.xlu1 %1600, %v1621_v54   ;;  %v804_v56 = vpop.xlane.xlu1 %803  ;;  %v795_v57 = vpop.xlane.xlu0 %794 }
 0x237   : > { %1634 = vpow2.f32 %v850_v0  ;;  %v826_v47 = vsub.f32 %v1887_v40, %v804_v56  ;;  %v823_v48 = vsub.f32 %v1884_v38, %v795_v57  ;;  %v1030_v0 = vld [vmem:[%s1817_s18 + $0x70] sm:$0xff]  ;;  %v1741_v56 = vmov 0   ;;  %v1029_v57 = vld [vmem:[%s1817_s18 + $0x68] sm:$0xff] }
 0x238   : > { %v1623_v58 = vpop.eup %1622  ;;  %1636 = vpow2.f32 %v844_v52 }
 0x239   : > { %v1625_v5 = vpop.eup %1624  ;;  %v854_v55 = vmul.f32 1.442695, %v826_v47  ;;  %v848_v33 = vmul.f32 1.442695, %v823_v48  ;;  %884 = vperm.xlu0 %1601, %v1623_v58   ;;  %v1031_v47 = vld [vmem:[%s1817_s18 + $0x78] sm:$0xff]  ;;  %v1742_v48 = vmov 0.0  }
 0x23a   : > { %874 = vperm.xlu1 %1600, %v1625_v5   ;;  %v810_v51 = vpop.xlane.xlu1 %809  ;;  %v801_v59 = vpop.xlane.xlu0 %800  ;;  %1544 = vmatprep.subr.bf16.mxu1 %v1742_v48  ;;  %v1027_v58 = vld [vmem:[%s1817_s18 + $0x58] sm:$0xff]  ;;  %v1028_v5 = vld [vmem:[%s1817_s18 + $0x60] sm:$0xff] }
 0x23b   : > { %1638 = vpow2.f32 %v854_v55  ;;  %v828_v60 = vsub.f32 %v1891_v43, %v810_v51  ;;  %v825_v62 = vsub.f32 %v1878_v34, %v801_v59  ;;  %v1026_v51 = vld [vmem:[%s1817_s18 + $0x50] sm:$0xff]  ;;  %1560 = vmatprep.mubr.msk.bf16.mxu1 %vm1744_vm8, %v1742_v48  ;;  %vm2301_vm8 = vmmov %vm2269_vm0 }
 0x23c   : > { %v1627_v63 = vpop.eup %1626  ;;  %1640 = vpow2.f32 %v848_v33  ;;  %v1025_v33 = vld [vmem:[%s1817_s18 + $0x48] sm:$0xff] }
 0x23d   : > { %v1629_v10 = vpop.eup %1628  ;;  %v858_v27 = vmul.f32 1.442695, %v828_v60  ;;  %v852_v18 = vmul.f32 1.442695, %v825_v62  ;;  %894 = vperm.xlu0 %1601, %v1627_v63   ;;  %v1023_v60 = vld [vmem:[%s1817_s18 + $0x38] sm:$0xff]  ;;  %v1024_v62 = vld [vmem:[%s1817_s18 + $0x40] sm:$0xff] }
 0x23e   : > { %879 = vperm.xlu1 %1600, %v1629_v10   ;;  %v807_v29 = vpop.xlane.xlu0 %806  ;;  %v1021_v10 = vld [vmem:[%s1817_s18 + $0x28] sm:$0xff] }
 0x23f   : > { %1642 = vpow2.f32 %v858_v27  ;;  %v827_v31 = vsub.f32 %v1893_v44, %v807_v29  ;;  %v1022_v27 = vld [vmem:[%s1817_s18 + $0x30] sm:$0xff]  ;;  %v1020_v29 = vld [vmem:[%s1817_s18 + $0x20] sm:$0xff] }
 0x240   : > { %v1631_v35 = vpop.eup %1630  ;;  %1644 = vpow2.f32 %v852_v18  ;;  %v1019_v18 = vld [vmem:[%s1817_s18 + $0x18] sm:$0xff] }
 0x241   : > { %v1633_v39 = vpop.eup %1632  ;;  %v856_v41 = vmul.f32 1.442695, %v827_v31  ;;  %904 = vperm.xlu0 %1601, %v1631_v35   ;;  %v1017_v31 = vld [vmem:[%s1817_s18 + $0x8] sm:$0xff]  ;;  %v1018_v35 = vld [vmem:[%s1817_s18 + $0x10] sm:$0xff] }
 0x242   : > { %889 = vperm.xlu1 %1600, %v1633_v39   ;;  %v813_v55 = vpop.xlane.xlu0 %812 }
 0x243   : > { %1646 = vpow2.f32 %v856_v41  ;;  %v829_v59 = vsub.f32 %v1897_v45, %v813_v55  ;;  %v1016_v41 = vld [vmem:[%s1817_s18] sm:$0xff] }
 0x244   : > { %v1635_v46 = vpop.eup %1634 }
 0x245   : > { %v1637_v49 = vpop.eup %1636  ;;  %914 = vperm.xlu0 %1601, %v1635_v46   ;;  %v860_v63 = vmul.f32 1.442695, %v829_v59  ;;  %v1013_v46 = vsel %vm2287_vm7, %v2045_v42, 0.0  ;;  %vm2300_vm7 = vmmov %vm2269_vm0 }
 0x246   : > { %899 = vperm.xlu1 %1600, %v1637_v49  }
 0x247   : > { %1648 = vpow2.f32 %v860_v63 }
 0x248   : > { %v1639_v50 = vpop.eup %1638 }
 0x249   : > { %v1641_v53 = vpop.eup %1640  ;;  %924 = vperm.xlu0 %1601, %v1639_v50  }
 0x24a   : > { %909 = vperm.xlu1 %1600, %v1641_v53  }
 0x24c   : > { %v1643_v25 = vpop.eup %1642 }
 0x24d   : > { %v1645_v54 = vpop.eup %1644  ;;  %934 = vperm.xlu0 %1601, %v1643_v25  }
 0x24e   : > { %919 = vperm.xlu1 %1600, %v1645_v54  }
 0x250   : > { %v1647_v52 = vpop.eup %1646 }
 0x251   : > { %1602 = vset.pattern.permute.xlu0 %v1741_v56 }
 0x252   : > { %929 = vperm.xlu1 %1600, %v1647_v52   ;;  %1104 = vperm.xlu0 %1602, %v1030_v0  }
 0x254   : > { %v1649_v39 = vpop.eup %1648 }
 0x256   : > { %1603 = vset.pattern.permute.xlu1 %v1741_v56  ;;  %1099 = vperm.xlu0 %1602, %v1029_v57  }
 0x257   : > { %1109 = vperm.xlu1 %1603, %v1031_v47  }
 0x25a   : > { %1089 = vperm.xlu0 %1602, %v1027_v58  }
 0x25b   : > { %1094 = vperm.xlu1 %1603, %v1028_v5  }
 0x25e   : > { %1079 = vperm.xlu0 %1602, %v1025_v33  }
 0x25f   : > { %1084 = vperm.xlu1 %1603, %v1026_v51  }
 0x262   : > { %1069 = vperm.xlu0 %1602, %v1023_v60  }
 0x263   : > { %1074 = vperm.xlu1 %1603, %v1024_v62  }
 0x266   : > { %1059 = vperm.xlu0 %1602, %v1021_v10  }
 0x267   : > { %1064 = vperm.xlu1 %1603, %v1022_v27  }
 0x26a   : > { %1049 = vperm.xlu0 %1602, %v1019_v18  }
 0x26b   : > { %1054 = vperm.xlu1 %1603, %v1020_v29  }
 0x26e   : > { %1039 = vperm.xlu0 %1602, %v1017_v31  }
 0x26f   : > { %1044 = vperm.xlu1 %1603, %v1018_v35  }
 0x273   : > { %1604 = vset.pattern.permute.xlu1 %v1740_v12 }
 0x274   : > { %939 = vperm.xlu1 %1604, %v1649_v39  }
 0x278   : > { %1605 = vset.pattern.permute.xlu1 %v1741_v56 }
 0x279   : > { %1034 = vperm.xlu1 %1605, %v1016_v41  }
 0x28d   : > { %1014 = vadd.xlane.f32.xlu0 %v1013_v46 }
 0x2a3   : > { %1204 = vrot.lane.b32.xlu0 %v1854_v17, %s1743_s30 }
 0x2a7   : > { %1206 = vrot.lane.b32.xlu0 %v1860_v21, %s1743_s30 }
 0x2ab   : > { %1208 = vrot.lane.b32.xlu0 %v1852_v15, %s1743_s30 }
 0x2af   : > { %1212 = vrot.lane.b32.xlu0 %v1869_v28, %s1743_s30 }
 0x2b0   : > { %v870_v12 = vpop.permute.xlu0 %869 }
 0x2b1   : > { %v865_v49 = vpop.permute.xlu1 %864  ;;  %v943_v50 = vmul.f32 %v1919_v3, %v870_v12 }
 0x2b2   : > { %v942_v42 = vmul.f32 %v1915_v1, %v865_v49 }
 0x2b3   : > { %1216 = vrot.lane.b32.xlu0 %v1864_v24, %s1743_s30  ;;  %v961_v5 = vsel %vm2289_vm10, %v943_v50, 0.0  ;;  %vm1252_vm10 = vcmask 7168  }
 0x2b4   : > { %v1136_v53 = vpack.c.bf16 %v943_v50, %v942_v42  ;;  %v885_v25 = vpop.permute.xlu0 %884  ;;  %v960_v58 = vsel %vm2288_vm9, %v942_v42, 0.0  ;;  %vm2302_vm9 = vmmov %vm2269_vm0 }
 0x2b5   : > { %v875_v54 = vpop.permute.xlu1 %874  ;;  %v946_v55 = vmul.f32 %v1926_v7, %v885_v25  ;;  %v962_v59 = vadd.f32 %v961_v5, %v960_v58 }
 0x2b6   : > { %1144 = vxpose.xlu1.c.b16.start [1/8] (narrow) %v1136_v53, 16  ;;  %v944_v56 = vmul.f32 %v1911_v61, %v875_v54 }
 0x2b7   : > { %1220 = vrot.lane.b32.xlu0 %v1881_v36, %s1743_s30  ;;  %v967_v39 = vsel %vm2292_vm15, %v946_v55, 0.0 }
 0x2b8   : > { %v895_v0 = vpop.permute.xlu0 %894  ;;  %v963_v61 = vsel %vm2290_vm11, %v944_v56, 0.0 }
 0x2b9   : > { %v880_v52 = vpop.permute.xlu1 %879  ;;  %v948_v63 = vmul.f32 %v1921_v4, %v895_v0  ;;  %v964_v7 = vadd.f32 %v963_v61, %v962_v59 }
 0x2ba   : > { %v945_v3 = vmul.f32 %v1917_v2, %v880_v52 }
 0x2bb   : > { %1224 = vrot.lane.b32.xlu0 %v1875_v32, %s1743_s30  ;;  %v971_v0 = vsel %vm2294_vm14, %v948_v63, 0.0 }
 0x2bc   : > { %v1137_v1 = vpack.c.bf16 %v945_v3, %v944_v56  ;;  %v905_v57 = vpop.permute.xlu0 %904  ;;  %v965_v62 = vsel %vm2291_vm12, %v945_v3, 0.0 }
 0x2bd   : > { %v890_v47 = vpop.permute.xlu1 %889  ;;  %v966_v18 = vadd.f32 %v965_v62, %v964_v7  ;;  %v950_v31 = vmul.f32 %v1934_v13, %v905_v57 }
 0x2be   : > { %v947_v33 = vmul.f32 %v1928_v8, %v890_v47  ;;  %1145 = vxpose.xlu1.c.b16.cont [2/8] (narrow) %v1137_v1, 16 }
 0x2bf   : > { %1228 = vrot.lane.b32.xlu0 %v1887_v40, %s1743_s30 }
 0x2c0   : > { %v1138_v2 = vpack.c.bf16 %v947_v33, %v946_v55  ;;  %v915_v51 = vpop.permute.xlu0 %914  ;;  %v969_v12 = vsel %vm2293_vm13, %v947_v33, 0.0  ;;  %v975_v33 = vsel %vm2296_vm5, %v950_v31, 0.0 }
 0x2c1   : > { %v900_v60 = vpop.permute.xlu1 %899  ;;  %v952_v49 = vmul.f32 %v1930_v9, %v915_v51 }
 0x2c2   : > { %v949_v10 = vmul.f32 %v1924_v6, %v900_v60  ;;  %1146 = vxpose.xlu1.c.b16.cont [3/8] (narrow) %v1138_v2, 16  ;;  %v968_v6 = vadd.f32 %v967_v39, %v966_v18 }
 0x2c3   : > { %1232 = vrot.lane.b32.xlu0 %v1891_v43, %s1743_s30  ;;  %v979_v18 = vsel %vm2297_vm2, %v952_v49, 0.0 }
 0x2c4   : > { %v1139_v8 = vpack.c.bf16 %v949_v10, %v948_v63  ;;  %v925_v27 = vpop.permute.xlu0 %924  ;;  %v970_v53 = vadd.f32 %v969_v12, %v968_v6  ;;  %v973_v1 = vsel %vm2295_vm4, %v949_v10, 0.0 }
 0x2c5   : > { %v910_v29 = vpop.permute.xlu1 %909 }
 0x2c6   : > { %v951_v35 = vmul.f32 %v1936_v14, %v910_v29  ;;  %1147 = vxpose.xlu1.c.b16.cont [4/8] (narrow) %v1139_v8, 16  ;;  %v954_v14 = vmul.f32 %v1938_v16, %v925_v27  ;;  %v972_v56 = vadd.f32 %v971_v0, %v970_v53 }
 0x2c8   : > { %v1140_v41 = vpack.c.bf16 %v951_v35, %v950_v31  ;;  %v2120_v4 = vpop.permute.xlu0 %934  ;;  %v974_v47 = vadd.f32 %v973_v1, %v972_v56  ;;  %v983_v53 = vsel %vm2299_vm6, %v954_v14, 0.0 }
 0x2c9   : > { %v920_v46 = vpop.permute.xlu1 %919 }
 0x2ca   : > { %v953_v50 = vmul.f32 %v1932_v11, %v920_v46  ;;  %1148 = vxpose.xlu1.c.b16.cont [5/8] (narrow) %v1140_v41, 16  ;;  %v976_v61 = vadd.f32 %v975_v33, %v974_v47  ;;  %v958_v33 = vld [vmem:[#allocation3] sm:$0x1] }
 0x2cc   : > { %v1141_v42 = vpack.c.bf16 %v953_v50, %v952_v49 }
 0x2cd   : > { %v930_v13 = vpop.permute.xlu1 %929  ;;  %v1105_v25 = vpop.permute.xlu0 %1104 }
 0x2ce   : > { %v955_v54 = vmul.f32 %v1941_v20, %v930_v13  ;;  %1149 = vxpose.xlu1.c.b16.cont [6/8] (narrow) %v1141_v42, 16  ;;  %v1126_v11 = vmul.f32 %v1105_v25, %v1891_v43  ;;  %v977_v43 = vsel %vm2269_vm0, %v951_v35, 0.0 }
 0x2cf   : > { %v978_v63 = vadd.f32 %v977_v43, %v976_v61 }
 0x2d0   : > { %v1142_v52 = vpack.c.bf16 %v955_v54, %v954_v14 }
 0x2d1   : > { %v1100_v3 = vpop.permute.xlu0 %1099  ;;  %v980_v29 = vadd.f32 %v979_v18, %v978_v63 }
 0x2d2   : > { %v1110_v9 = vpop.permute.xlu1 %1109  ;;  %1150 = vxpose.xlu1.c.b16.cont [7/8] (narrow) %v1142_v52, 16  ;;  %v1125_v20 = vmul.f32 %v1100_v3, %v1893_v44  ;;  %v956_v3 = vmul.f32 %v1943_v22, %v2120_v4 }
 0x2d3   : > { %v1127_v57 = vmul.f32 %v1110_v9, %v1897_v45 }
 0x2d4   : > { %v987_v9 = vsel %vm2301_vm8, %v956_v3, 0.0 }
 0x2d5   : > { %v1090_v58 = vpop.permute.xlu0 %1089  ;;  %v1135_v5 = vpack.c.bf16 %v1127_v57, %v1126_v11 }
 0x2d6   : > { %v1095_v16 = vpop.permute.xlu1 %1094  ;;  %v1123_v60 = vmul.f32 %v1090_v58, %v1878_v34 }
 0x2d7   : > { %v1124_v55 = vmul.f32 %v1095_v16, %v1887_v40  ;;  %1545 = vmatpush3.bf16.msra.mxu1 %v1135_v5 }
 0x2d8   : > { %1546 = vmatprep.subr.bf16.mxu1 %v1742_v48 }
 0x2d9   : > { %v1134_v2 = vpack.c.bf16 %v1125_v20, %v1124_v55  ;;  %v1080_v51 = vpop.permute.xlu0 %1079 }
 0x2da   : > { %v1085_v59 = vpop.permute.xlu1 %1084  ;;  %v1121_v8 = vmul.f32 %v1080_v51, %v1884_v38 }
 0x2db   : > { %v1122_v62 = vmul.f32 %v1085_v59, %v1875_v32  ;;  %1547 = vmatpush3.bf16.msra.mxu1 %v1134_v2  ;;  %v981_v32 = vsel %vm2298_vm3, %v953_v50, 0.0 }
 0x2dc   : > { %1548 = vmatprep.subr.bf16.mxu1 %v1742_v48  ;;  %v982_v46 = vadd.f32 %v981_v32, %v980_v29 }
 0x2dd   : > { %v1133_v40 = vpack.c.bf16 %v1123_v60, %v1122_v62  ;;  %v1070_v10 = vpop.permute.xlu0 %1069 }
 0x2de   : > { %v1075_v7 = vpop.permute.xlu1 %1074  ;;  %v1119_v41 = vmul.f32 %v1070_v10, %v1866_v26  ;;  %v984_v13 = vadd.f32 %v983_v53, %v982_v46 }
 0x2df   : > { %v1120_v27 = vmul.f32 %v1075_v7, %v1881_v36  ;;  %1549 = vmatpush3.bf16.msra.mxu1 %v1133_v40 }
 0x2e0   : > { %1550 = vmatprep.subr.bf16.mxu1 %v1742_v48 }
 0x2e1   : > { %v1132_v31 = vpack.c.bf16 %v1121_v8, %v1120_v27  ;;  %v1060_v39 = vpop.permute.xlu0 %1059  ;;  %v1200_v27 = vld [vmem:[#allocation4] sm:$0xff] }
 0x2e2   : > { %v1065_v35 = vpop.permute.xlu1 %1064  ;;  %v1117_v49 = vmul.f32 %v1060_v39, %v1872_v30 }
 0x2e3   : > { %v1118_v6 = vmul.f32 %v1065_v35, %v1864_v24  ;;  %1551 = vmatpush3.bf16.msra.mxu1 %v1132_v31  ;;  %v985_v24 = vsel %vm2300_vm7, %v955_v54, 0.0 }
 0x2e4   : > { %1552 = vmatprep.subr.bf16.mxu1 %v1742_v48 }
 0x2e5   : > { %v1131_v36 = vpack.c.bf16 %v1119_v41, %v1118_v6  ;;  %v1050_v50 = vpop.permute.xlu0 %1049 }
 0x2e6   : > { %v1055_v12 = vpop.permute.xlu1 %1054  ;;  %v1115_v52 = vmul.f32 %v1050_v50, %v1857_v19 }
 0x2e7   : > { %v1116_v42 = vmul.f32 %v1055_v12, %v1869_v28  ;;  %1553 = vmatpush3.bf16.msra.mxu1 %v1131_v36  ;;  %v986_v28 = vadd.f32 %v985_v24, %v984_v13 }
 0x2e8   : > { %1554 = vmatprep.subr.bf16.mxu1 %v1742_v48 }
 0x2e9   : > { %v1130_v25 = vpack.c.bf16 %v1117_v49, %v1116_v42  ;;  %v988_v54 = vadd.f32 %v987_v9, %v986_v28  ;;  %v1040_v57 = vpop.permute.xlu0 %1039 }
 0x2ea   : > { %v1045_v0 = vpop.permute.xlu1 %1044  ;;  %v1113_v22 = vmul.f32 %v1040_v57, %v1860_v21  ;;  %v959_v21 = vmul.f32 %v2036_v37, %v958_v33 }
 0x2eb   : > { %v1114_v56 = vmul.f32 %v1045_v0, %v1852_v15  ;;  %1555 = vmatpush3.bf16.msra.mxu1 %v1130_v25 }
 0x2ec   : > { %1556 = vmatprep.subr.bf16.mxu1 %v1742_v48 }
 0x2ed   : > { %v1129_v14 = vpack.c.bf16 %v1115_v52, %v1114_v56 }
 0x2ef   : > { %v940_v1 = vpop.permute.xlu1 %939  ;;  %1557 = vmatpush3.bf16.msra.mxu1 %v1129_v14 }
 0x2f0   : > { %v957_v11 = vmul.f32 %v1945_v23, %v940_v1  ;;  %1558 = vmatprep.subr.bf16.mxu1 %v1742_v48 }
 0x2f2   : > { %v989_v15 = vsel %vm2302_vm9, %v957_v11, 0.0  ;;  %v1143_v47 = vpack.c.bf16 %v957_v11, %v956_v3 }
 0x2f3   : > { %v990_v58 = vadd.f32 %v989_v15, %v988_v54 }
 0x2f4   : > { %v1035_v5 = vpop.permute.xlu1 %1034  ;;  %1151 = vxpose.xlu1.c.b16.end [8/8] (narrow) %v1143_v47, 16 }
 0x2f5   : > { %v991_v4 = vrot.slane %v990_v58, 4  ;;  %v1112_v16 = vmul.f32 %v1035_v5, %v1854_v17 }
 0x2f7   : > { %v992_v20 = vadd.f32 %v991_v4, %v990_v58  ;;  %v1128_v55 = vpack.c.bf16 %v1113_v22, %v1112_v16 }
 0x2f8   : > { %1210 = vrot.lane.b32.xlu1 %v1857_v19, %s1743_s30 }
 0x2f9   : > { %v993_v23 = vrot.slane %v992_v20, 2  ;;  %1559 = vmatpush3.bf16.msra.mxu1 %v1128_v55 }
 0x2fb   : > { %v994_v48 = vadd.f32 %v993_v23, %v992_v20 }
 0x2fc   : > { %1214 = vrot.lane.b32.xlu1 %v1872_v30, %s1743_s30 }
 0x2fd   : > { %v995_v61 = vrot.slane %v994_v48, 1 }
 0x2ff   : > { %v996_v2 = vadd.f32 %v995_v61, %v994_v48 }
 0x300   : > { %1218 = vrot.lane.b32.xlu1 %v1866_v26, %s1743_s30 }
 0x301   : > { %v997_v17 = vadd.f32 %v996_v2, %v959_v21 }
 0x303   : > { %999 = vst.msk [vmem:[#allocation3] sm:$0x1] %vm998_vm1, %v997_v17 }
 0x304   : > { %1222 = vrot.lane.b32.xlu1 %v1884_v38, %s1743_s30 }
 0x308   : > { %1226 = vrot.lane.b32.xlu1 %v1878_v34, %s1743_s30 }
 0x30c   : > { %1230 = vrot.lane.b32.xlu1 %v1893_v44, %s1743_s30 }
 0x310   : > { %1234 = vrot.lane.b32.xlu1 %v1897_v45, %s1743_s30 }
 0x316   : > { %v1015_v19 = vpop.xlane.xlu0 %1014 }
 0x317   : > { %v1201_v18 = vmul.f32 %v1200_v27, %v1015_v19 }
 0x31a   : > { %v1205_v26 = vpop.permute.xlu0 %1204 }
 0x31b   : > { %1253 = vst.msk [vmem:[%s1822_s21] sm:$0xff] %vm1252_vm10, %v1205_v26 }
 0x31e   : > { %v1207_v30 = vpop.permute.xlu0 %1206 }
 0x31f   : > { %1254 = vst.msk [vmem:[%s1822_s21 + $0x8] sm:$0xff] %vm1252_vm10, %v1207_v30 }
 0x322   : > { %v1209_v38 = vpop.permute.xlu0 %1208 }
 0x323   : > { %1255 = vst.msk [vmem:[%s1822_s21 + $0x10] sm:$0xff] %vm1252_vm10, %v1209_v38 }
 0x326   : > { %v1213_v34 = vpop.permute.xlu0 %1212 }
 0x327   : > { %1257 = vst.msk [vmem:[%s1822_s21 + $0x20] sm:$0xff] %vm1252_vm10, %v1213_v34 }
 0x32a   : > { %v1217_v44 = vpop.permute.xlu0 %1216 }
 0x32b   : > { %1259 = vst.msk [vmem:[%s1822_s21 + $0x30] sm:$0xff] %vm1252_vm10, %v1217_v44 }
 0x32e   : > { %v1221_v45 = vpop.permute.xlu0 %1220 }
 0x32f   : > { %1261 = vst.msk [vmem:[%s1822_s21 + $0x40] sm:$0xff] %vm1252_vm10, %v1221_v45 }
 0x332   : > { %v1225_v37 = vpop.permute.xlu0 %1224 }
 0x333   : > { %1263 = vst.msk [vmem:[%s1822_s21 + $0x50] sm:$0xff] %vm1252_vm10, %v1225_v37 }
 0x336   : > { %v1229_v51 = vpop.permute.xlu0 %1228 }
 0x337   : > { %1265 = vst.msk [vmem:[%s1822_s21 + $0x60] sm:$0xff] %vm1252_vm10, %v1229_v51 }
 0x33a   : > { %v1152_v43 = vpop.trf.xlu1  ;;  %v1233_v59 = vpop.permute.xlu0 %1232 }
 0x33b   : > { %1561 = vmatmul.mubr.bf16.vlgmr.msra.gmra.mxu1 %v1152_v43  ;;  %1267 = vst.msk [vmem:[%s1822_s21 + $0x70] sm:$0xff] %vm1252_vm10, %v1233_v59 }
 0x36a   : > { %v1211_v60 = vpop.permute.xlu1 %1210 }
 0x36b   : > { %1256 = vst.msk [vmem:[%s1822_s21 + $0x18] sm:$0xff] %vm1252_vm10, %v1211_v60 }
 0x36e   : > { %v1215_v62 = vpop.permute.xlu1 %1214 }
 0x36f   : > { %1258 = vst.msk [vmem:[%s1822_s21 + $0x28] sm:$0xff] %vm1252_vm10, %v1215_v62 }
 0x372   : > { %v1219_v63 = vpop.permute.xlu1 %1218 }
 0x373   : > { %1260 = vst.msk [vmem:[%s1822_s21 + $0x38] sm:$0xff] %vm1252_vm10, %v1219_v63 }
 0x376   : > { %v1223_v40 = vpop.permute.xlu1 %1222 }
 0x377   : > { %1262 = vst.msk [vmem:[%s1822_s21 + $0x48] sm:$0xff] %vm1252_vm10, %v1223_v40 }
 0x37a   : > { %v1227_v10 = vpop.permute.xlu1 %1226 }
 0x37b   : > { %1264 = vst.msk [vmem:[%s1822_s21 + $0x58] sm:$0xff] %vm1252_vm10, %v1227_v10 }
 0x37e   : > { %v1231_v7 = vpop.permute.xlu1 %1230 }
 0x37f   : > { %1266 = vst.msk [vmem:[%s1822_s21 + $0x68] sm:$0xff] %vm1252_vm10, %v1231_v7 }
 0x382   : > { %v1235_v8 = vpop.permute.xlu1 %1234 }
 0x383   : > { %1268 = vst.msk [vmem:[%s1822_s21 + $0x78] sm:$0xff] %vm1252_vm10, %v1235_v8 }
 0x3fb   : > { %v1194_v29 = vpop.f32.mrf.mxu1 }
 0x3fc   : > { %v1202_v31 = vadd.f32 %v1201_v18, %v1194_v29 }
 0x3fd   : > { %v1562_v32 = vpop.f32.mrf.mxu1  ;;  %1272 = sbr.rel (%p1457_p5) target bundleno = 1028 (0x404), region = 48 }
 0x3fe   : > { %1203 = vst [vmem:[#allocation4] sm:$0xff] %v1202_v31 }
 0x3ff   : > { %v1197_v35 = vpop.f32.mrf.mxu1 }
 0x401   : > { %v1563_v39 = vpop.f32.mrf.mxu1 }
 0x402   : > { %v1273_v41 = vld [vmem:[#allocation2] sm:$0x1]  ;;  %v1275_v6 = vld [vmem:[#allocation3] sm:$0x1] }
 0x403   : > { %1274 = vst.msk [vmem:[#allocation6] sm:$0x1] %vm998_vm1, %v1273_v41  ;;  %1276 = vst.msk [vmem:[#allocation8] sm:$0x1] %vm998_vm1, %v1275_v6 }
 0x404 PF: > { %p1576_p6 = scmp.eq.s32.totalorder %s1799_s28, 1  ;;  %s1745_s9 = smov [#allocation6]  }
 0x405   : > { %s1300_s10 = sshll.u32 %s1745_s9, 4  ;;  %s1746_s11 = smov [#allocation4]   ;;  %s1301_s10 = int_to_ptr.vmem [resolvable:$true] %s1300_s10 }
 0x406   : > { %s1289_s12 = sshll.u32 %s1746_s11, 4  ;;  %s1650_s13 = scalar_lea.vmem %s1301_s10, 16  ;;  %s1290_s12 = int_to_ptr.vmem [resolvable:$true] %s1289_s12 }
 0x407   : > { %p1651_p7 = scmp.ne.s32.totalorder %s1301_s10, %s1650_s13  ;;  %s1656_s14 = scalar_lea.vmem %s1301_s10, 32 }
 0x408   : > { %p1657_p10 = scmp.lt.s32.totalorder %s1301_s10, %s1301_s10  ;;  %p1658_p11 = scmp.lt.s32.totalorder %s1656_s14, %s1650_s13 }
 0x409   : > { %p1652_p8 = pnand %p1651_p7, %p1576_p6 }
 0x40a   : > { %p1659_p12 = por %p1658_p11, %p1657_p10 }
 0x40b   : > { %p1653_p9 = pneg %p1652_p8 }
 0x40d   : > { %p1660_p13 = pnand %p1659_p12, %p1653_p9 }
 0x40f   : > { %1663 = shalt.err (!%p1660_p13)
}
 0x410   : > { %1567 = dma.vmem_to_hbm [thread:$0]  (%p1576_p6), %s1301_s10, 16, %s2253_s6, [#allocation7]  }
 0x411   : > { %s1674_s17 = scalar_lea.vmem %s1290_s12, 128  ;;  %p1681_p3 = scmp.lt.s32.totalorder %s1290_s12, %s1290_s12 }
 0x412   : > { %p1675_p0 = scmp.ne.s32.totalorder %s1290_s12, %s1674_s17  ;;  %p1682_p4 = scmp.lt.s32.totalorder %s1674_s17, %s1674_s17 }
 0x414   : > { %p1676_p1 = pnand %p1675_p0, %p1576_p6  ;;  %p1683_p5 = por %p1682_p4, %p1681_p3 }
 0x416   : > { %p1677_p2 = pneg %p1676_p1 }
 0x418   : > { %p1684_p7 = pnand %p1683_p5, %p1677_p2 }
 0x41a   : > { %1687 = shalt.err (!%p1684_p7)
}
 0x41b   : > { %1565 = dma.vmem_to_hbm [thread:$0]  (%p1576_p6), %s1290_s12, 128, %s2252_s5, [#allocation5]  }
 0x41c   : > { %s1747_s20 = smov [#allocation8]  }
 0x41d   : > { %s1311_s21 = sshll.u32 %s1747_s20, 4  ;;  %s1312_s21 = int_to_ptr.vmem [resolvable:$true] %s1311_s21 }
 0x41e   : > { %s1698_s22 = scalar_lea.vmem %s1312_s21, 16  ;;  %s1704_s23 = scalar_lea.vmem %s1312_s21, 32 }
 0x41f   : > { %p1699_p8 = scmp.ne.s32.totalorder %s1312_s21, %s1698_s22  ;;  %p1705_p11 = scmp.lt.s32.totalorder %s1312_s21, %s1312_s21 }
 0x420   : > { %p1706_p12 = scmp.lt.s32.totalorder %s1704_s23, %s1698_s22 }
 0x421   : > { %p1700_p9 = pnand %p1699_p8, %p1576_p6 }
 0x422   : > { %p1707_p13 = por %p1706_p12, %p1705_p11 }
 0x423   : > { %p1701_p10 = pneg %p1700_p9 }
 0x425   : > { %p1708_p0 = pnand %p1707_p13, %p1701_p10 }
 0x427   : > { %1711 = shalt.err (!%p1708_p0)
}
 0x428   : > { %1569 = dma.vmem_to_hbm [thread:$0]  (%p1576_p6), %s1312_s21, 16, %s2254_s7, [#allocation7]  }
 0x429   : > { %1727 = dma.done.wait (%p1576_p6), [#allocation5], 128  }
 0x42a   : > { %1729 = vsyncadd (%p1576_p6), [#allocation5], 4294967168 }
 0x42b   : > { %1731 = dma.done.wait (%p1576_p6), [#allocation7], 32  }
 0x42c   : > { %1733 = vsyncadd (%p1576_p6), [#allocation7], 4294967264 }
 0x42d PF: > { %s21_s27 = sadd.s32 1, %s1736_s27  }
 0x42e   : > { %p18_p1 = scmp.ge.s32.totalorder %s21_s27, 4  }
 0x430   :  { %20 = sbr.rel (!%p18_p1) target bundleno = 2 (0x2), region = 109 }
 0x435   :  { %1344 = vsyncpa [#allocation5], 1 }
 0x436   :  { %1346 = vsyncpa [#allocation5 + $0x1], 1 }
 0x437   :  { %1347 = vsyncpa [#allocation7], 1 }

</bundles_post_ra>
